<compile_context>
chip_gen: v5e
topology: v5e:2x2
jax: 0.10.0
libtpu: 0.0.40
codegen_flags: <defaults>
</compile_context>

<pallas_src>
import math
import functools

import jax
import jax.numpy as jnp
from jax.experimental import pallas as pl
from jax.experimental.pallas import tpu as pltpu


def _round_up(n, m):
    return ((n + m - 1) // m) * m


def _clamp_vmem(estimate_bytes):
    """2x the buffer estimate, but never above ~85% of physical VMEM."""
    try:
        info = pltpu.get_tpu_info()
        cap = int(getattr(info, "vmem_capacity_bytes", 0)) or 64 * 1024 * 1024
    except Exception:
        cap = 64 * 1024 * 1024  # conservative fallback (v7x per-TensorCore VMEM)
    limit = max(2 * int(estimate_bytes), 32 * 1024 * 1024)
    return int(min(limit, int(0.85 * cap)))


# ----------------------------- kernel 1: QKV projection -----------------------------

def _qkv_proj_kernel(x_ref, w_ref, b_ref, q_ref, k_ref, v_ref, *, embed_dim):
    # x_ref : (1, tq, D) bf16     w_ref : (D, 3E) bf16 (head-contiguous [Q|K|V],
    #                                      Q columns pre-scaled by 1/sqrt(hd))
    # b_ref : (1, 3E) f32         q/k/v_ref : (1, tq, E) bf16
    x = x_ref[0]                                                       # [tq, D]
    qkv = jnp.dot(x, w_ref[...], preferred_element_type=jnp.float32)   # [tq, 3E] f32
    qkv = (qkv + b_ref[0]).astype(jnp.bfloat16)
    q_ref[0] = qkv[:, :embed_dim]
    k_ref[0] = qkv[:, embed_dim:2 * embed_dim]
    v_ref[0] = qkv[:, 2 * embed_dim:]


# ----------------------------- kernel 2: attention + o-proj -------------------------

def _attn_kernel(q_ref, k_ref, v_ref, wo_ref, bo_ref, o_ref, vals_ref, *,
                 num_heads, head_dim, seq_len):
    # q_ref : (1, tq, E) bf16 (pre-scaled)   k_ref/v_ref : (1, Sp, E) bf16
    # wo_ref: (E, E) bf16                    bo_ref : (1, E) f32
    # o_ref : (1, tq, E)                     vals_ref : (tq, E) bf16 VMEM scratch
    q = q_ref[0]                         # [tq, E]
    k = k_ref[0]                         # [Sp, E]
    v = v_ref[0]                         # [Sp, E]
    sp = k.shape[0]

    # Static mask bias for padded key positions (only materialized if padding exists).
    if sp != seq_len:
        kidx = jax.lax.broadcasted_iota(jnp.int32, (1, sp), 1)
        mask_bias = jnp.where(kidx < seq_len, 0.0, -1e30).astype(jnp.float32)
    else:
        mask_bias = None

    for h in range(num_heads):
        lo = h * head_dim
        hi = lo + head_dim
        qh = q[:, lo:hi]                 # [tq, hd]
        kh = k[:, lo:hi]                 # [Sp, hd]
        vh = v[:, lo:hi]                 # [Sp, hd]

        # Contract last dims directly (no k.T -> no per-head XLU transpose).
        logits = jax.lax.dot_general(
            qh, kh, (((1,), (1,)), ((), ())),
            preferred_element_type=jnp.float32)                        # [tq, Sp]
        if mask_bias is not None:
            logits = logits + mask_bias

        m = jnp.max(logits, axis=-1, keepdims=True)
        e = jnp.exp(logits - m)                                        # [tq, Sp] f32
        denom = jnp.sum(e, axis=-1, keepdims=True)                     # [tq, 1]

        # Deferred normalization: AV with unnormalized weights, then scale the
        # small [tq, hd] result by the EUP approximate reciprocal.
        head_out = jnp.dot(e.astype(jnp.bfloat16), vh,
                           preferred_element_type=jnp.float32)         # [tq, hd]
        head_out = head_out * pl.reciprocal(denom, approx=True)
        vals_ref[:, lo:hi] = head_out.astype(jnp.bfloat16)

    # Single output projection with full contraction depth K = E.
    out = jnp.dot(vals_ref[...], wo_ref[...], preferred_element_type=jnp.float32)
    o_ref[0] = (out + bo_ref[0]).astype(o_ref.dtype)


# ----------------------------- wrapper -----------------------------------------------

def multihead_attention(x, wqkv, bqkv, wo, bo, *, num_heads, q_tile=256):
    """x: [B, S, D]; wqkv: [3E, D]; bqkv: [3E]; wo: [E, E]; bo: [E]."""
    B, S, D = x.shape
    E = wo.shape[0]
    assert E % num_heads == 0
    head_dim = E // num_heads
    scale = 1.0 / math.sqrt(head_dim)

    # ---- host-side reorder: interleaved per-head [q|k|v] columns -> [Q|K|V] ----
    # PyTorch reshape(B,S,H,3*hd)+chunk puts head h's q at cols h*3hd+[0:hd],
    # k at +hd, v at +2hd of the flat qkv output. Permute so kernels see
    # [q_h0..q_hH | k_h0..k_hH | v_h0..v_hH] (head-contiguous, lane-friendly).
    heads = jnp.arange(num_heads)
    offs = jnp.arange(head_dim)
    qcols = (heads[:, None] * (3 * head_dim) + offs[None, :]).reshape(-1)    # [E]
    perm = jnp.concatenate([qcols, qcols + head_dim, qcols + 2 * head_dim])  # [3E]

    wqkv_p = wqkv[perm]                              # [3E, D]
    bqkv_p = bqkv[perm]                              # [3E]

    # Fold 1/sqrt(hd) into the Q columns so no rescale happens inside any kernel.
    col_scale = jnp.concatenate(
        [jnp.full((E,), scale, dtype=jnp.float32),
         jnp.ones((2 * E,), dtype=jnp.float32)])
    w_qkv_t = (wqkv_p.T * col_scale[None, :]).astype(jnp.bfloat16)   # [D, 3E]
    b_qkv = (bqkv_p * col_scale).reshape(1, 3 * E).astype(jnp.float32)

    wo_t = wo.T.astype(jnp.bfloat16)                 # [E, E]
    bo2 = bo.reshape(1, E).astype(jnp.float32)

    # ---- query tiling with padding (no more tq = S fallback) ----
    tq = min(q_tile, _round_up(S, 8))
    S_pad = _round_up(S, tq)
    x_bf = x.astype(jnp.bfloat16)
    if S_pad != S:
        x_bf = jnp.pad(x_bf, ((0, 0), (0, S_pad - S), (0, 0)))

    out_itemsize = jnp.dtype(x.dtype).itemsize

    # ---- projection kernel ----
    proj_est = (2 * tq * D * 2                 # x tile (bf16, 2 bufs)
                + 2 * D * 3 * E * 2            # qkv weight (bf16, 2 bufs)
                + 2 * 3 * E * 4                # bias
                + 3 * 2 * tq * E * 2           # q/k/v output tiles (2 bufs)
                + tq * 3 * E * 4)              # f32 qkv intermediate
    proj_cost = pl.CostEstimate(
        flops=int(2 * B * S_pad * D * 3 * E),
        transcendentals=0,
        bytes_accessed=int(B * S_pad * D * 2 + D * 3 * E * 2 + 3 * E * 4
                           + 3 * B * S_pad * E * 2))

    q_all, k_all, v_all = pl.pallas_call(
        functools.partial(_qkv_proj_kernel, embed_dim=E),
        out_shape=tuple(jax.ShapeDtypeStruct((B, S_pad, E), jnp.bfloat16)
                        for _ in range(3)),
        grid_spec=pltpu.PrefetchScalarGridSpec(
            num_scalar_prefetch=0,
            grid=(B, S_pad // tq),
            in_specs=[
                pl.BlockSpec((1, tq, D), lambda b, i: (b, i, 0)),     # x tile
                pl.BlockSpec((D, 3 * E), lambda b, i: (0, 0)),        # qkv weight
                pl.BlockSpec((1, 3 * E), lambda b, i: (0, 0)),        # qkv bias
            ],
            out_specs=[
                pl.BlockSpec((1, tq, E), lambda b, i: (b, i, 0)),
                pl.BlockSpec((1, tq, E), lambda b, i: (b, i, 0)),
                pl.BlockSpec((1, tq, E), lambda b, i: (b, i, 0)),
            ],
        ),
        compiler_params=pltpu.CompilerParams(
            dimension_semantics=("parallel", "parallel"),
            vmem_limit_bytes=_clamp_vmem(proj_est)),
        cost_estimate=proj_cost,
    )(x_bf, w_qkv_t, b_qkv)

    # ---- attention + output projection kernel ----
    attn_est = (2 * tq * E * 2                 # q tile (bf16, 2 bufs)
                + 2 * 2 * S_pad * E * 2        # k, v full seq (bf16, 2 bufs each)
                + 2 * E * E * 2                # wo (2 bufs)
                + 2 * E * 4                    # bo
                + 2 * tq * E * out_itemsize    # output tile (2 bufs)
                + tq * E * 2                   # bf16 concat scratch
                + tq * S_pad * (4 + 4 + 2))    # logits f32 + e f32 + e bf16
    attn_cost = pl.CostEstimate(
        flops=int(B * (4 * S_pad * S_pad * E + 2 * S_pad * E * E)),
        transcendentals=int(B * num_heads * S_pad * S_pad),
        bytes_accessed=int(3 * B * S_pad * E * 2 + E * E * 2 + E * 4
                           + B * S_pad * E * out_itemsize))

    out = pl.pallas_call(
        functools.partial(_attn_kernel, num_heads=num_heads,
                          head_dim=head_dim, seq_len=S),
        out_shape=jax.ShapeDtypeStruct((B, S_pad, E), x.dtype),
        grid_spec=pltpu.PrefetchScalarGridSpec(
            num_scalar_prefetch=0,
            grid=(B, S_pad // tq),
            in_specs=[
                pl.BlockSpec((1, tq, E), lambda b, i: (b, i, 0)),      # q tile
                pl.BlockSpec((1, S_pad, E), lambda b, i: (b, 0, 0)),   # k (full seq)
                pl.BlockSpec((1, S_pad, E), lambda b, i: (b, 0, 0)),   # v (full seq)
                pl.BlockSpec((E, E), lambda b, i: (0, 0)),             # wo
                pl.BlockSpec((1, E), lambda b, i: (0, 0)),             # bo
            ],
            out_specs=pl.BlockSpec((1, tq, E), lambda b, i: (b, i, 0)),
            scratch_shapes=[pltpu.VMEM((tq, E), jnp.bfloat16)],
        ),
        compiler_params=pltpu.CompilerParams(
            dimension_semantics=("parallel", "parallel"),
            vmem_limit_bytes=_clamp_vmem(attn_est)),
        cost_estimate=attn_cost,
    )(q_all, k_all, v_all, wo_t, bo2)

    if S_pad != S:
        out = out[:, :S, :]
    return out


# ----------------------------- reference & test ---------------------------------------

def _xavier_uniform(key, shape, dtype=jnp.float32):
    fan_out, fan_in = shape  # PyTorch Linear weight is [out_features, in_features]
    bound = math.sqrt(6.0 / (fan_in + fan_out))
    return jax.random.uniform(key, shape, dtype, minval=-bound, maxval=bound)


def _reference(x, wqkv, bqkv, wo, bo, num_heads):
    # Pure-JAX (f32) replica of the PyTorch forward for verification.
    B, S, D = x.shape
    E = wo.shape[0]
    hd = E // num_heads
    qkv = x @ wqkv.T + bqkv                              # [B, S, 3E]
    qkv = qkv.reshape(B, S, num_heads, 3 * hd).transpose(0, 2, 1, 3)
    q, k, v = jnp.split(qkv, 3, axis=-1)                 # each [B, H, S, hd]
    logits = jnp.einsum('bhqd,bhkd->bhqk', q, k) / math.sqrt(hd)
    attn = jax.nn.softmax(logits, axis=-1)
    vals = jnp.einsum('bhqk,bhkd->bhqd', attn, v)
    vals = vals.transpose(0, 2, 1, 3).reshape(B, S, E)
    return vals @ wo.T + bo


if __name__ == "__main__":
    def run_case(B, S, input_dim, embed_dim, num_heads):
        key = jax.random.PRNGKey(0)
        kx, kw1, kw2, kb1, kb2 = jax.random.split(key, 5)
        x = jax.random.normal(kx, (B, S, input_dim), dtype=jnp.float32)
        # Module init is xavier_uniform_ weights + zero biases; small nonzero biases
        # exercise the (permuted / scale-folded) bias path — semantics identical.
        wqkv = _xavier_uniform(kw1, (3 * embed_dim, input_dim))
        bqkv = 0.1 * jax.random.normal(kb1, (3 * embed_dim,), dtype=jnp.float32)
        wo = _xavier_uniform(kw2, (embed_dim, embed_dim))
        bo = 0.1 * jax.random.normal(kb2, (embed_dim,), dtype=jnp.float32)

        out = multihead_attention(x, wqkv, bqkv, wo, bo, num_heads=num_heads)
        out = jax.block_until_ready(out)
        ref = _reference(x, wqkv, bqkv, wo, bo, num_heads)
        assert out.shape == (B, S, embed_dim)
        max_err = float(jnp.max(jnp.abs(out - ref)))
        # bf16 operands with f32 accumulation -> relaxed tolerance vs f32 reference.
        assert jnp.allclose(out, ref, atol=5e-2, rtol=5e-2), \
            f"mismatch vs reference (max abs err {max_err})"

    run_case(2, 8, 32, 32, 4)    # exact tiling path
    run_case(2, 12, 32, 32, 4)   # padded sequence path (exercises key masking)
    print("KERNEL_OK")
</pallas_src>

<mosaic_0001>
module attributes {stable_mosaic.version = 11 : i64} {
  func.func @_qkv_proj_kernel(%arg0: i32, %arg1: i32, %arg2: memref<1x8x32xbf16, #tpu.memory_space<vmem>>, %arg3: memref<32x96xbf16, #tpu.memory_space<vmem>>, %arg4: memref<1x96xf32, #tpu.memory_space<vmem>>, %arg5: memref<1x8x32xbf16, #tpu.memory_space<vmem>>, %arg6: memref<1x8x32xbf16, #tpu.memory_space<vmem>>, %arg7: memref<1x8x32xbf16, #tpu.memory_space<vmem>>) attributes {dimension_semantics = [#tpu.dimension_semantics<parallel>, #tpu.dimension_semantics<parallel>], iteration_bounds = array<i64: 2, 1>, scalar_prefetch = 0 : i64, scratch_operands = 0 : i64, tpu.core_type = #tpu.core_type<tc>, window_params = [{transform_indices = @transform_0, window_bounds = array<i64: 1, 8, 32>}, {pipeline_mode = #tpu.pipeline_mode<synchronous>, transform_indices = @transform_1, window_bounds = array<i64: 32, 96>}, {pipeline_mode = #tpu.pipeline_mode<synchronous>, transform_indices = @transform_2, window_bounds = array<i64: 1, 96>}, {transform_indices = @transform_3, window_bounds = array<i64: 1, 8, 32>}, {transform_indices = @transform_4, window_bounds = array<i64: 1, 8, 32>}, {transform_indices = @transform_5, window_bounds = array<i64: 1, 8, 32>}]} {
    %c0 = arith.constant 0 : index
    %c0_0 = arith.constant 0 : index
    %c0_1 = arith.constant 0 : index
    %0 = vector.load %arg2[%c0, %c0_0, %c0_1] : memref<1x8x32xbf16, #tpu.memory_space<vmem>>, vector<1x8x32xbf16>
    %1 = vector.shape_cast %0 : vector<1x8x32xbf16> to vector<8x32xbf16>
    %c0_2 = arith.constant 0 : index
    %c0_3 = arith.constant 0 : index
    %2 = vector.load %arg3[%c0_2, %c0_3] : memref<32x96xbf16, #tpu.memory_space<vmem>>, vector<32x96xbf16>
    %cst = arith.constant dense<0.000000e+00> : vector<8x96xf32>
    %3 = tpu.matmul %1, %2, %cst {dimension_numbers = #tpu.dot_dimension_numbers<[1], [0], [0], [1], [0, 0, 1, 1], [], []>} : vector<8x32xbf16>, vector<32x96xbf16>, vector<8x96xf32> -> vector<8x96xf32>
    %c0_4 = arith.constant 0 : index
    %c0_5 = arith.constant 0 : index
    %4 = vector.load %arg4[%c0_4, %c0_5] : memref<1x96xf32, #tpu.memory_space<vmem>>, vector<1x96xf32>
    %5 = vector.shape_cast %4 : vector<1x96xf32> to vector<96xf32>
    %6 = vector.shape_cast %5 : vector<96xf32> to vector<1x96xf32>
    %7 = vector.broadcast %6 : vector<1x96xf32> to vector<8x96xf32>
    %8 = arith.addf %3, %7 : vector<8x96xf32>
    %9 = arith.truncf %8 : vector<8x96xf32> to vector<8x96xbf16>
    %10 = vector.extract_strided_slice %9 {offsets = [0, 0], sizes = [8, 32], strides = [1, 1]} : vector<8x96xbf16> to vector<8x32xbf16>
    %c0_6 = arith.constant 0 : index
    %c0_7 = arith.constant 0 : index
    %c0_8 = arith.constant 0 : index
    %11 = vector.load %arg5[%c0_6, %c0_7, %c0_8] : memref<1x8x32xbf16, #tpu.memory_space<vmem>>, vector<1x8x32xbf16>
    %12 = vector.shape_cast %11 : vector<1x8x32xbf16> to vector<8x32xbf16>
    %13 = vector.shape_cast %10 : vector<8x32xbf16> to vector<1x8x32xbf16>
    tpu.vector_store %arg5[%c0_6, %c0_7, %c0_8], %13 {strides = array<i32>} : memref<1x8x32xbf16, #tpu.memory_space<vmem>>, vector<1x8x32xbf16>,
    %14 = vector.extract_strided_slice %9 {offsets = [0, 32], sizes = [8, 32], strides = [1, 1]} : vector<8x96xbf16> to vector<8x32xbf16>
    %c0_9 = arith.constant 0 : index
    %c0_10 = arith.constant 0 : index
    %c0_11 = arith.constant 0 : index
    %15 = vector.load %arg6[%c0_9, %c0_10, %c0_11] : memref<1x8x32xbf16, #tpu.memory_space<vmem>>, vector<1x8x32xbf16>
    %16 = vector.shape_cast %15 : vector<1x8x32xbf16> to vector<8x32xbf16>
    %17 = vector.shape_cast %14 : vector<8x32xbf16> to vector<1x8x32xbf16>
    tpu.vector_store %arg6[%c0_9, %c0_10, %c0_11], %17 {strides = array<i32>} : memref<1x8x32xbf16, #tpu.memory_space<vmem>>, vector<1x8x32xbf16>,
    %18 = vector.extract_strided_slice %9 {offsets = [0, 64], sizes = [8, 32], strides = [1, 1]} : vector<8x96xbf16> to vector<8x32xbf16>
    %c0_12 = arith.constant 0 : index
    %c0_13 = arith.constant 0 : index
    %c0_14 = arith.constant 0 : index
    %19 = vector.load %arg7[%c0_12, %c0_13, %c0_14] : memref<1x8x32xbf16, #tpu.memory_space<vmem>>, vector<1x8x32xbf16>
    %20 = vector.shape_cast %19 : vector<1x8x32xbf16> to vector<8x32xbf16>
    %21 = vector.shape_cast %18 : vector<8x32xbf16> to vector<1x8x32xbf16>
    tpu.vector_store %arg7[%c0_12, %c0_13, %c0_14], %21 {strides = array<i32>} : memref<1x8x32xbf16, #tpu.memory_space<vmem>>, vector<1x8x32xbf16>,
    return
  }
  func.func @transform_0(%arg0: i32, %arg1: i32) -> (i32, i32, i32) {
    %c0_i32 = arith.constant 0 : i32
    %c0_i32_0 = arith.constant 0 : i32
    return %arg0, %arg1, %c0_i32 : i32, i32, i32
  }
  func.func @transform_1(%arg0: i32, %arg1: i32) -> (i32, i32) {
    %c0_i32 = arith.constant 0 : i32
    %c0_i32_0 = arith.constant 0 : i32
    %c0_i32_1 = arith.constant 0 : i32
    return %c0_i32, %c0_i32_0 : i32, i32
  }
  func.func @transform_2(%arg0: i32, %arg1: i32) -> (i32, i32) {
    %c0_i32 = arith.constant 0 : i32
    %c0_i32_0 = arith.constant 0 : i32
    %c0_i32_1 = arith.constant 0 : i32
    return %c0_i32, %c0_i32_0 : i32, i32
  }
  func.func @transform_3(%arg0: i32, %arg1: i32) -> (i32, i32, i32) {
    %c0_i32 = arith.constant 0 : i32
    %c0_i32_0 = arith.constant 0 : i32
    return %arg0, %arg1, %c0_i32 : i32, i32, i32
  }
  func.func @transform_4(%arg0: i32, %arg1: i32) -> (i32, i32, i32) {
    %c0_i32 = arith.constant 0 : i32
    %c0_i32_0 = arith.constant 0 : i32
    return %arg0, %arg1, %c0_i32 : i32, i32, i32
  }
  func.func @transform_5(%arg0: i32, %arg1: i32) -> (i32, i32, i32) {
    %c0_i32 = arith.constant 0 : i32
    %c0_i32_0 = arith.constant 0 : i32
    return %arg0, %arg1, %c0_i32 : i32, i32, i32
  }
}

</mosaic_0001>

<bundles_post_ra>
// kernel: tpu_custom_call.1
= control target key start
LH: loop header
LB: loop body
LE: loop exit
PB: predicated region body
PF: predicated region fallthrough
CT: control target
= control target key end

     0   :  { %s1119_s0 = inlined_call_operand.hbm [shape: bf16[2,8,32], index: 0, kind: input, shape index: {}]   ;;  %s1120_s1 = inlined_call_operand.hbm [shape: bf16[32,96], index: 1, kind: input, shape index: {}]   ;;  %s1121_s2 = inlined_call_operand.vmem [shape: f32[1,96], index: 2, kind: input, shape index: {}]   ;;  %s1122_s3 = inlined_call_operand.hbm [shape: bf16[2,8,32], index: 3, kind: output, shape index: {0}]   ;;  %s1123_s4 = inlined_call_operand.hbm [shape: bf16[2,8,32], index: 4, kind: output, shape index: {1}]   ;;  %s1124_s5 = inlined_call_operand.hbm [shape: bf16[2,8,32], index: 5, kind: output, shape index: {2}]  }
   0x1   :  { %1126 = sst [smem:[#allocation15_spill]] %s1119_s0 }
   0x2   :  { %11 = vsyncpa [#allocation3], 0 }
   0x3   :  { %13 = vsyncpa [#allocation3 + $0x1], 0 }
   0x4   :  { %14 = vsyncpa [#allocation6], 0 }
   0x5   :  { %15 = vsyncpa [#allocation4], 0 }
   0x6   :  { %17 = vsyncpa [#allocation4 + $0x1], 0 }
   0x7   :  { %18 = vsyncpa [#allocation9], 0 }
   0x8   :  { %20 = vsyncpa [#allocation9 + $0x1], 0  ;;  %s924_s18 = smov 0   ;;  %s926_s19 = smov 0  }
   0x9   :  { %s928_s20 = smov 0   ;;  %s930_s21 = smov 0  }
   0xa   :  { %s932_s22 = smov 0   ;;  %s934_s23 = smov 0  }
   0xb LB: > { %s955_s24 = sadd.s32 4294967295, %s887_s23   ;;  %p563_p0 = scmp.ge.s32.totalorder %s887_s23, 1  ;;  %s887_s23 = sphi %s934_s23, %s26_s23   ;;  %s883_s22 = sphi %s932_s22, %s1138_s22   ;;  %s879_s21 = sphi %s930_s21, %s1137_s21   ;;  %s875_s20 = sphi %s928_s20, %s1136_s20   ;;  %s871_s19 = sphi %s926_s19, %s1135_s19   ;;  %s867_s18 = sphi %s924_s18, %s1134_s18  }
   0xc   : > { %p61_p1 = scmp.eq.s32.totalorder %s955_s24, 0  ;;  %p197_p2 = scmp.lt.s32.totalorder %s887_s23, 3 }
   0xd   : > { %s208_s27 = sshll.u32 %s1120_s1, 4  ;;  %s889_s29 = smov [#allocation5]   ;;  %s209_s27 = int_to_ptr.hbm [resolvable:$true] %s208_s27 }
   0xe   : > { %p963_p3 = pnand %p563_p0, %p197_p2  ;;  %s210_s30 = sshll.u32 %s889_s29, 4  ;;  %s211_s30 = int_to_ptr.vmem [resolvable:$true] %s210_s30 }
   0xf   : > { %p565_p6 = scmp.ge.s32.totalorder %s887_s23, 2  ;;  %s890_s6 = smov 64  }
  0x10   : > { %p605_p4 = pneg %p963_p3  ;;  %s891_s7 = smov 4  }
  0x11   : > { %s1125_s8 = sadd.s32 4294967294, %s887_s23   ;;  %s38_s9 = sadd.s32 1, %s883_s22 }
  0x12   : > { %p606_p5 = pnand %p605_p4, %p61_p1  ;;  %s47_s10 = sadd.s32 1, %s875_s20 }
  0x13   : > { %p40_p7 = scmp.ge.s32.totalorder %s38_s9, 2  ;;  %p54_p8 = scmp.ne.s32.totalorder %s875_s20, %s871_s19 }
  0x14   : > { %608 = dma.hbm_to_vmem [thread:$0]  (!%p606_p5), %s209_s27, 256, %s211_s30, [#allocation6], %s890_s6, %s890_s6, %s891_s7  }
  0x15   : > { %p55_p9 = scmp.eq.s32.totalorder %s887_s23, 0  ;;  %p60_p10 = scmp.ne.s32.totalorder %s871_s19, %s867_s18 }
  0x16   : > { %s1140_s9 = smov (%p40_p7, %s38_s9), 0  ;;  %p128_p13 = scmp.eq.s32.totalorder %s955_s24, 1 }
  0x17   : > { %p982_p11 = por %p55_p9, %p54_p8  ;;  %p988_p12 = por %p61_p1, %p60_p10 }
  0x18   : > { %s42_s13 = ssub.s32 %s883_s22, %s1140_s9  ;;  %p134_p2 = scmp.eq.s32.totalorder %s1125_s8, 1 }
  0x19   : > { %p45_p0 = scmp.eq.s32.totalorder %s42_s13, 0  ;;  %p997_p4 = por %p128_p13, %p54_p8 }
  0x1a   : > { %p624_p5 = scmp.lt.s32.totalorder %s887_s23, 2  ;;  %p1005_p7 = por %p134_p2, %p60_p10 }
  0x1b   : > { %s1003_s15 = scalar_select %p45_p0, %s875_s20, %s47_s10  }
  0x1c   : > { %s227_s17 = sand.u32 1, %s875_s20   ;;  %s567_s26 = sshll.u32 %s883_s22, 2 }
  0x1d   : > { %s566_s25 = sshll.u32 %s227_s17, 2  ;;  %s1132_s0 = sld [smem:[#allocation15_spill]] }
  0x1e   : > { %s231_s6 = scalar_lea.vmem [#allocation2], %s566_s25  ;;  %p610_p8 = pnand %p624_p5, %p982_p11 }
  0x1f   : > { %s240_s7 = sshll.u32 %s231_s6, 4  ;;  %s228_s10 = scalar_lea.sflag [#allocation3], %s227_s17  ;;  %s241_s7 = int_to_ptr.vmem [resolvable:$true] %s240_s7 }
  0x20   : > { %s1019_s8 = sand.u32 (!%p963_p3), 1, %s871_s19  }
  0x21   : > { %249 = sbr.rel (%p963_p3) target bundleno = 310 (0x136), region = 32  ;;  %s1022_s27 = sshll.u32 (!%p963_p3), %s1019_s8, 2 }
  0x22   : > { %s252_s25 = scalar_lea.sflag (!%p963_p3), [#allocation3], %s1019_s8 }
  0x23   : > { %s236_s30 = scalar_lea.hbm %s1132_s0, %s567_s26  ;;  %s255_s26 = scalar_lea.vmem (!%p963_p3), [#allocation2], %s1022_s27 }
  0x24   : > { %s238_s13 = sshll.u32 %s236_s30, 4  ;;  %s239_s13 = int_to_ptr.hbm [resolvable:$true] %s238_s13 }
  0x25   : > { %612 = dma.hbm_to_vmem [thread:$0]  (!%p610_p8), %s239_s13, 64, %s241_s7, %s228_s10  }
  0x26   : > { %850 = dma.done.wait (%p988_p12), %s252_s25, 64  }
  0x27   : > { %852 = vsyncadd (%p988_p12), %s252_s25, 4294967232 }
  0x28   : > { %854 = dma.done.wait (%p61_p1), [#allocation6], 256  }
  0x29   : > { %856 = vsyncadd (%p61_p1), [#allocation6], 4294967040  ;;  %v592_v0 = vld [vmem:[#allocation5 + $0x8] sm:$0xff]  ;;  %v591_v1 = vld [vmem:[#allocation5] sm:$0xff]  ;;  %vm320_vm0 = vcmask 261120   ;;  %s1038_s12 = sshll.u32 %s879_s21, 2 }
  0x2a   : > { %330 = vmatpush.bf16.msra.mxu0 %v592_v0  ;;  %v299_v2 = vld [vmem:[%s255_s26] sm:$0xf]  ;;  %s371_s30 = scalar_lea.hbm %s1122_s3, %s1038_s12  ;;  %vm338_vm1 = vcmask 257024   ;;  %s283_s6 = scalar_lea.vmem [#allocation7], %s1022_s27 }
  0x2b   : > { %v680_v3 = vld [vmem:[%s1121_s2] ss:$0 sm:$0xff]  ;;  %s373_s7 = sshll.u32 %s283_s6, 4  ;;  %s375_s13 = sshll.u32 %s371_s30, 4  ;;  %s374_s7 = int_to_ptr.vmem [resolvable:$true] %s373_s7  ;;  %s376_s13 = int_to_ptr.hbm [resolvable:$true] %s375_s13 }
  0x2c   : > { %s892_s10 = smov 96   ;;  %s350_s21 = scalar_lea.sflag [#allocation4], %s1019_s8 }
  0x2d   : > { %s755_s25 = sshra.s32 %s376_s13, 4  ;;  %s761_s17 = scalar_lea.hbm %s1122_s3, 8  ;;  %s756_s25 = int_to_ptr.hbm [resolvable:$true] %s755_s25 }
  0x2e   : > { %331 = vmatpush.bf16.msra.mxu0 %v591_v1  ;;  %s757_s26 = scalar_lea.hbm %s756_s25, 4  ;;  %p762_p10 = scmp.lt.s32.totalorder %s756_s25, %s1122_s3 }
  0x2f   : > { %p758_p1 = scmp.ne.s32.totalorder %s756_s25, %s757_s26  ;;  %p763_p11 = scmp.lt.s32.totalorder %s761_s17, %s757_s26 }
  0x31   : > { %582 = vmatmul.msk.bf16.vlgmr.msra.gmra.mxu0 %vm320_vm0, %v299_v2  ;;  %p759_p3 = pnand %p758_p1, %p997_p4  ;;  %p764_p12 = por %p763_p11, %p762_p10 }
  0x33   : > { %p760_p9 = pneg %p759_p3 }
  0x35   : > { %p765_p13 = pnand %p764_p12, %p760_p9 }
  0xae   : > { %v333_v4 = vpop.f32.mrf.mxu0 }
  0xaf   : > { %v334_v5 = vadd.f32 %v680_v3, %v333_v4 }
  0xb1   : > { %v337_v6 = vpack.c.bf16 %v334_v5, %v334_v5 }
  0xb3   : > { %341 = vrot.lane.b32.xlu0 %v337_v6, %s892_s10  ;;  %339 = vst.msk [vmem:[%s283_s6] sm:$0xf] %vm338_vm1, %v337_v6 }
  0xb4   : > { %768 = shalt.err (!%p765_p13)
}
  0xb5   : > { %599 = dma.vmem_to_hbm [thread:$0]  (%p997_p4), %s374_s7, 64, %s376_s13, %s350_s21  }
  0xb6   : > { %v335_v7 = vpop.f32.mrf.mxu0  ;;  %s893_s8 = smov 64   ;;  %s386_s28 = scalar_lea.hbm %s1123_s4, %s1038_s12 }
  0xb7   : > { %s354_s25 = sand.u32 1, %s955_s24   ;;  %s290_s26 = scalar_lea.vmem [#allocation8], %s1022_s27 }
  0xb8   : > { %s388_s11 = sshll.u32 %s290_s26, 4  ;;  %s390_s17 = sshll.u32 %s386_s28, 4  ;;  %s389_s11 = int_to_ptr.vmem [resolvable:$true] %s388_s11  ;;  %s391_s17 = int_to_ptr.hbm [resolvable:$true] %s390_s17 }
  0xb9   : > { %s401_s7 = scalar_lea.hbm %s1124_s5, %s1038_s12  ;;  %s1068_s13 = scalar_lea.sflag [#allocation9], %s354_s25 }
  0xba   : > { %s783_s21 = sshra.s32 %s391_s17, 4  ;;  %s789_s10 = scalar_lea.hbm %s1123_s4, 8  ;;  %s784_s21 = int_to_ptr.hbm [resolvable:$true] %s783_s21 }
  0xbb   : > { %345 = vrot.lane.b32.xlu0 %v337_v6, %s893_s8  ;;  %s785_s8 = scalar_lea.hbm %s784_s21, 4  ;;  %p790_p8 = scmp.lt.s32.totalorder %s784_s21, %s1123_s4 }
  0xbc   : > { %p786_p0 = scmp.ne.s32.totalorder %s784_s21, %s785_s8  ;;  %p791_p1 = scmp.lt.s32.totalorder %s789_s10, %s785_s8 }
  0xbe   : > { %p787_p2 = pnand %p786_p0, %p997_p4  ;;  %p792_p3 = por %p791_p1, %p790_p8 }
  0xc0   : > { %p788_p5 = pneg %p787_p2 }
  0xc2   : > { %p793_p9 = pnand %p792_p3, %p788_p5 }
 0x125   : > { %v342_v8 = vpop.permute.xlu0 %341 }
 0x126   : > { %344 = vst.msk [vmem:[%s290_s26] sm:$0xf] %vm338_vm1, %v342_v8 }
 0x127   : > { %796 = shalt.err (!%p793_p9)
}
 0x128   : > { %600 = dma.vmem_to_hbm [thread:$0]  (%p997_p4), %s389_s11, 64, %s391_s17, %s1068_s13  }
 0x129   : > { %s297_s12 = scalar_lea.vmem [#allocation10], %s1022_s27  ;;  %s405_s26 = sshll.u32 %s401_s7, 4  ;;  %s406_s26 = int_to_ptr.hbm [resolvable:$true] %s405_s26 }
 0x12a   : > { %s403_s25 = sshll.u32 %s297_s12, 4  ;;  %s811_s0 = sshra.s32 %s406_s26, 4  ;;  %s404_s25 = int_to_ptr.vmem [resolvable:$true] %s403_s25  ;;  %s812_s0 = int_to_ptr.hbm [resolvable:$true] %s811_s0 }
 0x12b   : > { %s813_s29 = scalar_lea.hbm %s812_s0, 4  ;;  %s817_s8 = scalar_lea.hbm %s1124_s5, 8 }
 0x12c   : > { %p814_p10 = scmp.ne.s32.totalorder %s812_s0, %s813_s29  ;;  %p818_p13 = scmp.lt.s32.totalorder %s812_s0, %s1124_s5 }
 0x12d   : > { %v346_v9 = vpop.permute.xlu0 %345  ;;  %p819_p0 = scmp.lt.s32.totalorder %s817_s8, %s813_s29 }
 0x12e   : > { %348 = vst.msk [vmem:[%s297_s12] sm:$0xf] %vm338_vm1, %v346_v9  ;;  %p815_p11 = pnand %p814_p10, %p997_p4 }
 0x12f   : > { %p820_p2 = por %p819_p0, %p818_p13 }
 0x130   : > { %p816_p12 = pneg %p815_p11 }
 0x132   : > { %p821_p5 = pnand %p820_p2, %p816_p12 }
 0x134   : > { %824 = shalt.err (!%p821_p5)
}
 0x135   : > { %601 = dma.vmem_to_hbm [thread:$0]  (%p997_p4), %s404_s25, 64, %s406_s26, %s1068_s13  }
 0x136 PF: > { %s417_s17 = sand.u32 1, %s867_s18   ;;  %p614_p8 = pnand %p565_p6, %p1005_p7 }
 0x137   : > { %s418_s7 = scalar_lea.sflag [#allocation4], %s417_s17 }
 0x138   : > { %p615_p1 = pneg %p614_p8 }
 0x13a   : > { %858 = dma.done.wait (%p615_p1), %s418_s7, 64  }
 0x13b   : > { %860 = vsyncadd (%p615_p1), %s418_s7, 4294967232  ;;  %s1133_s24 = sadd.s32 4294967294, %s887_s23  }
 0x13c   : > { %s427_s6 = sand.u32 1, %s1133_s24  }
 0x13d   : > { %s428_s10 = scalar_lea.sflag [#allocation9], %s427_s6 }
 0x13e   : > { %862 = dma.done.wait (%p615_p1), %s428_s10, 128  }
 0x13f   : > { %864 = vsyncadd (%p615_p1), %s428_s10, 4294967168  ;;  %s26_s23 = sadd.s32 1, %s887_s23   ;;  %s1134_s18 = smov %s871_s19 }
 0x140   : > { %p23_p4 = scmp.ge.s32.totalorder %s26_s23, 4   ;;  %s1135_s19 = smov %s875_s20 }
 0x141   : > { %s1136_s20 = smov %s1003_s15  ;;  %s1137_s21 = smov %s883_s22 }
 0x142   : > { %s1138_s22 = smov %s1140_s9  ;;  %25 = sbr.rel (!%p23_p4) target bundleno = 11 (0xb), region = 113 }
 0x147   :  { %444 = vsyncpa [#allocation3], 1 }
 0x148   :  { %446 = vsyncpa [#allocation3 + $0x1], 1 }
 0x149   :  { %447 = vsyncpa [#allocation6], 1 }
 0x14a   :  { %448 = vsyncpa [#allocation4], 1 }
 0x14b   :  { %450 = vsyncpa [#allocation4 + $0x1], 1 }
 0x14c   :  { %451 = vsyncpa [#allocation9], 1 }
 0x14d   :  { %453 = vsyncpa [#allocation9 + $0x1], 1 }

</bundles_post_ra>
